<compile_context>
chip_gen: v5e
topology: v5e:2x2
jax: 0.10.0
libtpu: 0.0.40
codegen_flags: <defaults>
</compile_context>

<pallas_src>
import functools

import jax
import jax.numpy as jnp
from jax.experimental import pallas as pl
from jax.experimental.pallas import tpu as pltpu


def _round_up(v, m):
    return ((v + m - 1) // m) * m


def _vmem_budget_bytes():
    """Usable per-core VMEM budget: ~75% of physical, capped at 100 MiB."""
    try:
        cap = int(pltpu.get_tpu_info().vmem_capacity_bytes)
    except Exception:
        cap = 64 * 1024 * 1024          # conservative default (v7x per-core)
    return min(int(cap * 0.75), 100 * 1024 * 1024)


def _pick_bt(B, max_bt):
    """Largest bt <= max_bt, preferring a divisor of B (avoids padded batches)."""
    if max_bt <= 1:
        return 1
    for cand in range(max_bt, max(1, max_bt // 2), -1):
        if B % cand == 0:
            return cand
    return max_bt


def _permequi2_whole_set_kernel(x_ref, wg_ref, wl_ref, bg_ref, o_ref, *, inv_n):
    # x_ref : (BT, Np, Din)   -- whole (zero-padded) set axis in one block
    # wg_ref: (Din, Dout_p)   -- Gamma weight, pre-transposed, resident
    # wl_ref: (Din, Dout_p)   -- Lambda weight, pre-transposed, resident
    # bg_ref: (1, Dout_p)     -- Gamma bias (f32)
    # o_ref : (BT, Np, Dout_p)
    x = x_ref[...]
    bt, n_p, din = x.shape

    # f32-accumulated mean over the TRUE set length (padded rows are zero).
    xm = jnp.sum(x, axis=1, dtype=jnp.float32) * inv_n                 # (BT, Din) f32

    # shift = bias - Lambda(mean): bias folded into one broadcast row.
    # (xm cast back to operand dtype; for bf16 operands the subtracted term
    #  carries bf16 input precision -- documented, cost of a uniform MXU path.)
    lam = jnp.dot(xm.astype(x.dtype), wl_ref[...],
                  preferred_element_type=jnp.float32)                   # (BT, Dout_p)
    shift = bg_ref[...] - lam                                           # (BT, Dout_p)

    # Gamma(x): one MXU matmul over all BT*Np rows of this block.
    gamma = jnp.dot(x.reshape(bt * n_p, din), wg_ref[...],
                    preferred_element_type=jnp.float32)                 # (BT*Np, Dout_p)

    o_ref[...] = (gamma.reshape(bt, n_p, -1) + shift[:, None, :]).astype(o_ref.dtype)


def _permequi2_ntiled_kernel(x_ref, xm_ref, wg_ref, wl_ref, bg_ref, o_ref):
    # Fallback for very large sets: mean is precomputed in the wrapper.
    # x_ref : (1, TN, Din)   xm_ref: (1, 1, Din)   o_ref: (1, TN, Dout_p)
    x = x_ref[...]
    bt, tn, din = x.shape
    lam = jnp.dot(xm_ref[0], wl_ref[...],
                  preferred_element_type=jnp.float32)                   # (1, Dout_p)
    shift = bg_ref[...] - lam                                           # (1, Dout_p)
    gamma = jnp.dot(x.reshape(bt * tn, din), wg_ref[...],
                    preferred_element_type=jnp.float32)                 # (TN, Dout_p)
    o_ref[...] = (gamma.reshape(bt, tn, -1) + shift[:, None, :]).astype(o_ref.dtype)


def _perm_equi2_impl(x, w_gamma, b_gamma, w_lambda, *, block_rows,
                     force_ntiled, compute_dtype, single_buffer_weights):
    B, N, Din = x.shape
    Dout = w_gamma.shape[0]
    out_dtype = x.dtype

    # Operand dtype: keep the caller's dtype unless an explicit compute dtype
    # (e.g. bf16 for f32 callers) is requested; accumulation is f32 either way.
    op_dtype = jnp.dtype(compute_dtype) if compute_dtype is not None else jnp.dtype(x.dtype)
    x_op = x if x.dtype == op_dtype else x.astype(op_dtype)
    wg_t = jnp.asarray(w_gamma, op_dtype).T                    # (Din, Dout)
    wl_t = jnp.asarray(w_lambda, op_dtype).T                   # (Din, Dout)
    bg = jnp.asarray(b_gamma, jnp.float32).reshape(1, Dout)    # f32 bias row

    # Lane-dense output: pad Dout to a multiple of 128 (padded cols stay zero).
    Dout_p = _round_up(Dout, 128)
    if Dout_p != Dout:
        pad = Dout_p - Dout
        wg_t = jnp.pad(wg_t, ((0, 0), (0, pad)))
        wl_t = jnp.pad(wl_t, ((0, 0), (0, pad)))
        bg = jnp.pad(bg, ((0, 0), (0, pad)))

    itemsize = op_dtype.itemsize
    budget = _vmem_budget_bytes()
    headroom = 2 << 20
    # Weights single-buffered (constant index_map) + f32 bias row.
    w_bytes = 2 * Din * Dout_p * itemsize + Dout_p * 4
    wmode = pl.Buffered(1) if single_buffer_weights else None

    def whole_set_need(bt, rows):
        # double-buffered x and out blocks + resident weights + headroom
        return 2 * bt * rows * (Din + Dout_p) * itemsize + w_bytes + headroom

    N8 = _round_up(N, 8)    # sublane-aligned set axis

    if (not force_ntiled) and whole_set_need(1, N8) <= budget:
        # ---------- whole-set path: full (padded) set axis in one block ----------
        max_bt = max(1, min(B, block_rows // N8))
        while max_bt > 1 and whole_set_need(max_bt, N8) > budget:
            max_bt = max(1, max_bt // 2)
        bt = _pick_bt(B, max_bt)
        Bp = _round_up(B, bt)
        xp = x_op
        if Bp != B or N8 != N:
            xp = jnp.pad(x_op, ((0, Bp - B), (0, N8 - N), (0, 0)))

        kernel = functools.partial(_permequi2_whole_set_kernel, inv_n=1.0 / N)
        grid_spec = pltpu.PrefetchScalarGridSpec(
            num_scalar_prefetch=0,
            grid=(Bp // bt,),
            in_specs=[
                pl.BlockSpec((bt, N8, Din), lambda b: (b, 0, 0)),
                pl.BlockSpec((Din, Dout_p), lambda b: (0, 0), pipeline_mode=wmode),
                pl.BlockSpec((Din, Dout_p), lambda b: (0, 0), pipeline_mode=wmode),
                pl.BlockSpec((1, Dout_p), lambda b: (0, 0), pipeline_mode=wmode),
            ],
            out_specs=pl.BlockSpec((bt, N8, Dout_p), lambda b: (b, 0, 0)),
        )
        out = pl.pallas_call(
            kernel,
            out_shape=jax.ShapeDtypeStruct((Bp, N8, Dout_p), out_dtype),
            grid_spec=grid_spec,
            compiler_params=pltpu.CompilerParams(
                dimension_semantics=("parallel",),
                vmem_limit_bytes=budget,
            ),
        )(xp, wg_t, wl_t, bg)
        return out[:B, :N, :Dout]

    # ---------- N-tiled fallback: mean by XLA in the wrapper, kernel tiles N ----------
    xm = jnp.mean(x_op.astype(jnp.float32), axis=1, keepdims=True).astype(op_dtype)  # (B,1,Din)

    def ntiled_need(rows):
        return (2 * rows * (Din + Dout_p) * itemsize + w_bytes
                + 2 * Din * itemsize + headroom)

    tn = min(1024, N8)
    while tn > 8 and ntiled_need(tn) > budget:
        tn = max(8, tn // 2)
    Nt = _round_up(N, tn)
    xp = x_op if Nt == N else jnp.pad(x_op, ((0, 0), (0, Nt - N), (0, 0)))

    grid_spec = pltpu.PrefetchScalarGridSpec(
        num_scalar_prefetch=0,
        grid=(B, Nt // tn),
        in_specs=[
            pl.BlockSpec((1, tn, Din), lambda b, n: (b, n, 0)),
            pl.BlockSpec((1, 1, Din), lambda b, n: (b, 0, 0)),
            pl.BlockSpec((Din, Dout_p), lambda b, n: (0, 0), pipeline_mode=wmode),
            pl.BlockSpec((Din, Dout_p), lambda b, n: (0, 0), pipeline_mode=wmode),
            pl.BlockSpec((1, Dout_p), lambda b, n: (0, 0), pipeline_mode=wmode),
        ],
        out_specs=pl.BlockSpec((1, tn, Dout_p), lambda b, n: (b, n, 0)),
    )
    out = pl.pallas_call(
        _permequi2_ntiled_kernel,
        out_shape=jax.ShapeDtypeStruct((B, Nt, Dout_p), out_dtype),
        grid_spec=grid_spec,
        compiler_params=pltpu.CompilerParams(
            dimension_semantics=("parallel", "parallel"),
            vmem_limit_bytes=budget,
        ),
    )(xp, xm, wg_t, wl_t, bg)
    return out[:, :N, :Dout]


def perm_equi2(x, w_gamma, b_gamma, w_lambda, *, block_rows=512,
               force_ntiled=False, compute_dtype=None):
    """x: (B, N, D_in); w_*: (D_out, D_in) torch-layout; b_gamma: (D_out,)."""
    kwargs = dict(block_rows=block_rows, force_ntiled=force_ntiled,
                  compute_dtype=compute_dtype)
    try:
        # Preferred: single-buffered resident weights (pipeline_mode=Buffered(1)).
        out = _perm_equi2_impl(x, w_gamma, b_gamma, w_lambda,
                               single_buffer_weights=True, **kwargs)
        return jax.block_until_ready(out)
    except Exception:
        # Portability fallback: default (double) buffering for the weights.
        out = _perm_equi2_impl(x, w_gamma, b_gamma, w_lambda,
                               single_buffer_weights=False, **kwargs)
        return jax.block_until_ready(out)


def perm_equi2_ref(x, w_gamma, b_gamma, w_lambda):
    """Pure-JAX reference matching the PyTorch forward."""
    xm = jnp.mean(x, axis=1, keepdims=True)
    lam = xm @ w_lambda.T
    gam = x @ w_gamma.T + b_gamma
    return gam - lam


if __name__ == "__main__":
    key = jax.random.PRNGKey(0)
    k_x, k_wg, k_bg, k_wl = jax.random.split(key, 4)

    B, N, D_in, D_out = 2, 8, 32, 32

    x = jax.random.normal(k_x, (B, N, D_in), dtype=jnp.float32)
    # Deterministic torch-Linear-like init (uniform with scale 1/sqrt(in_dim)).
    bound = 1.0 / (D_in ** 0.5)
    w_gamma = jax.random.uniform(k_wg, (D_out, D_in), jnp.float32, -bound, bound)
    b_gamma = jax.random.uniform(k_bg, (D_out,), jnp.float32, -bound, bound)
    w_lambda = jax.random.uniform(k_wl, (D_out, D_in), jnp.float32, -bound, bound)

    ref = perm_equi2_ref(x, w_gamma, b_gamma, w_lambda)

    # Main (whole-set) path.
    out = perm_equi2(x, w_gamma, b_gamma, w_lambda)
    out = jax.block_until_ready(out)
    assert out.shape == (B, N, D_out)
    assert jnp.allclose(out, ref, atol=1e-5, rtol=1e-5), "whole-set path mismatch"

    # Exercise the N-tiled fallback path (wrapper-side mean + set-axis tiling).
    out_t = perm_equi2(x, w_gamma, b_gamma, w_lambda, force_ntiled=True)
    out_t = jax.block_until_ready(out_t)
    assert jnp.allclose(out_t, ref, atol=1e-5, rtol=1e-5), "N-tiled path mismatch"

    print("KERNEL_OK")
</pallas_src>

<mosaic_0001>
module attributes {stable_mosaic.version = 11 : i64} {
  func.func @_permequi2_whole_set_kernel(%arg0: i32, %arg1: memref<2x8x32xf32, #tpu.memory_space<vmem>>, %arg2: memref<32x128xf32, #tpu.memory_space<vmem>>, %arg3: memref<32x128xf32, #tpu.memory_space<vmem>>, %arg4: memref<1x128xf32, #tpu.memory_space<vmem>>, %arg5: memref<2x8x128xf32, #tpu.memory_space<vmem>>) attributes {dimension_semantics = [#tpu.dimension_semantics<parallel>], iteration_bounds = array<i64: 1>, scalar_prefetch = 0 : i64, scratch_operands = 0 : i64, tpu.core_type = #tpu.core_type<tc>, window_params = [{transform_indices = @transform_0, window_bounds = array<i64: 2, 8, 32>}, {pipeline_mode = #tpu.pipeline_mode<synchronous>, transform_indices = @transform_1, window_bounds = array<i64: 32, 128>}, {pipeline_mode = #tpu.pipeline_mode<synchronous>, transform_indices = @transform_2, window_bounds = array<i64: 32, 128>}, {pipeline_mode = #tpu.pipeline_mode<synchronous>, transform_indices = @transform_3, window_bounds = array<i64: 1, 128>}, {transform_indices = @transform_4, window_bounds = array<i64: 2, 8, 128>}]} {
    %c0 = arith.constant 0 : index
    %c0_0 = arith.constant 0 : index
    %c0_1 = arith.constant 0 : index
    %0 = vector.load %arg1[%c0, %c0_0, %c0_1] : memref<2x8x32xf32, #tpu.memory_space<vmem>>, vector<2x8x32xf32>
    %cst = arith.constant dense<0.000000e+00> : vector<2x32xf32>
    %1 = vector.multi_reduction <add>, %0, %cst [1] : vector<2x8x32xf32> to vector<2x32xf32>
    %cst_2 = arith.constant 1.250000e-01 : f32
    %2 = vector.broadcast %cst_2 : f32 to vector<2x32xf32>
    %3 = arith.mulf %1, %2 : vector<2x32xf32>
    %c0_3 = arith.constant 0 : index
    %c0_4 = arith.constant 0 : index
    %4 = vector.load %arg3[%c0_3, %c0_4] : memref<32x128xf32, #tpu.memory_space<vmem>>, vector<32x128xf32>
    %cst_5 = arith.constant dense<0.000000e+00> : vector<2x128xf32>
    %5 = tpu.matmul %3, %4, %cst_5 {dimension_numbers = #tpu.dot_dimension_numbers<[1], [0], [0], [1], [0, 0, 1, 1], [], []>} : vector<2x32xf32>, vector<32x128xf32>, vector<2x128xf32> -> vector<2x128xf32>
    %c0_6 = arith.constant 0 : index
    %c0_7 = arith.constant 0 : index
    %6 = vector.load %arg4[%c0_6, %c0_7] : memref<1x128xf32, #tpu.memory_space<vmem>>, vector<1x128xf32>
    %7 = vector.broadcast %6 : vector<1x128xf32> to vector<2x128xf32>
    %8 = arith.subf %7, %5 : vector<2x128xf32>
    %9 = vector.shape_cast %0 : vector<2x8x32xf32> to vector<16x32xf32>
    %c0_8 = arith.constant 0 : index
    %c0_9 = arith.constant 0 : index
    %10 = vector.load %arg2[%c0_8, %c0_9] : memref<32x128xf32, #tpu.memory_space<vmem>>, vector<32x128xf32>
    %cst_10 = arith.constant dense<0.000000e+00> : vector<16x128xf32>
    %11 = tpu.matmul %9, %10, %cst_10 {dimension_numbers = #tpu.dot_dimension_numbers<[1], [0], [0], [1], [0, 0, 1, 1], [], []>} : vector<16x32xf32>, vector<32x128xf32>, vector<16x128xf32> -> vector<16x128xf32>
    %12 = vector.shape_cast %11 : vector<16x128xf32> to vector<2x8x128xf32>
    %13 = vector.shape_cast %8 : vector<2x128xf32> to vector<2x1x128xf32>
    %14 = vector.broadcast %13 : vector<2x1x128xf32> to vector<2x8x128xf32>
    %15 = arith.addf %12, %14 : vector<2x8x128xf32>
    %c0_11 = arith.constant 0 : index
    %c0_12 = arith.constant 0 : index
    %c0_13 = arith.constant 0 : index
    %16 = vector.load %arg5[%c0_11, %c0_12, %c0_13] : memref<2x8x128xf32, #tpu.memory_space<vmem>>, vector<2x8x128xf32>
    tpu.vector_store %arg5[%c0_11, %c0_12, %c0_13], %15 {strides = array<i32>} : memref<2x8x128xf32, #tpu.memory_space<vmem>>, vector<2x8x128xf32>,
    return
  }
  func.func @transform_0(%arg0: i32) -> (i32, i32, i32) {
    %c0_i32 = arith.constant 0 : i32
    %c0_i32_0 = arith.constant 0 : i32
    %c0_i32_1 = arith.constant 0 : i32
    return %arg0, %c0_i32, %c0_i32_0 : i32, i32, i32
  }
  func.func @transform_1(%arg0: i32) -> (i32, i32) {
    %c0_i32 = arith.constant 0 : i32
    %c0_i32_0 = arith.constant 0 : i32
    %c0_i32_1 = arith.constant 0 : i32
    return %c0_i32, %c0_i32_0 : i32, i32
  }
  func.func @transform_2(%arg0: i32) -> (i32, i32) {
    %c0_i32 = arith.constant 0 : i32
    %c0_i32_0 = arith.constant 0 : i32
    %c0_i32_1 = arith.constant 0 : i32
    return %c0_i32, %c0_i32_0 : i32, i32
  }
  func.func @transform_3(%arg0: i32) -> (i32, i32) {
    %c0_i32 = arith.constant 0 : i32
    %c0_i32_0 = arith.constant 0 : i32
    %c0_i32_1 = arith.constant 0 : i32
    return %c0_i32, %c0_i32_0 : i32, i32
  }
  func.func @transform_4(%arg0: i32) -> (i32, i32, i32) {
    %c0_i32 = arith.constant 0 : i32
    %c0_i32_0 = arith.constant 0 : i32
    %c0_i32_1 = arith.constant 0 : i32
    return %arg0, %c0_i32, %c0_i32_0 : i32, i32, i32
  }
}

module attributes {stable_mosaic.version = 11 : i64} {
  func.func @_permequi2_whole_set_kernel(%arg0: i32, %arg1: memref<2x8x32xf32, #tpu.memory_space<vmem>>, %arg2: memref<32x128xf32, #tpu.memory_space<vmem>>, %arg3: memref<32x128xf32, #tpu.memory_space<vmem>>, %arg4: memref<1x128xf32, #tpu.memory_space<vmem>>, %arg5: memref<2x8x128xf32, #tpu.memory_space<vmem>>) attributes {dimension_semantics = [#tpu.dimension_semantics<parallel>], iteration_bounds = array<i64: 1>, scalar_prefetch = 0 : i64, scratch_operands = 0 : i64, tpu.core_type = #tpu.core_type<tc>, window_params = [{transform_indices = @transform_0, window_bounds = array<i64: 2, 8, 32>}, {pipeline_mode = #tpu.pipeline_mode<synchronous>, transform_indices = @transform_1, window_bounds = array<i64: 32, 128>}, {pipeline_mode = #tpu.pipeline_mode<synchronous>, transform_indices = @transform_2, window_bounds = array<i64: 32, 128>}, {pipeline_mode = #tpu.pipeline_mode<synchronous>, transform_indices = @transform_3, window_bounds = array<i64: 1, 128>}, {transform_indices = @transform_4, window_bounds = array<i64: 2, 8, 128>}]} {
    %c0 = arith.constant 0 : index
    %c0_0 = arith.constant 0 : index
    %c0_1 = arith.constant 0 : index
    %0 = vector.load %arg1[%c0, %c0_0, %c0_1] : memref<2x8x32xf32, #tpu.memory_space<vmem>>, vector<2x8x32xf32>
    %cst = arith.constant dense<0.000000e+00> : vector<2x32xf32>
    %1 = vector.multi_reduction <add>, %0, %cst [1] : vector<2x8x32xf32> to vector<2x32xf32>
    %cst_2 = arith.constant 1.250000e-01 : f32
    %2 = vector.broadcast %cst_2 : f32 to vector<2x32xf32>
    %3 = arith.mulf %1, %2 : vector<2x32xf32>
    %c0_3 = arith.constant 0 : index
    %c0_4 = arith.constant 0 : index
    %4 = vector.load %arg3[%c0_3, %c0_4] : memref<32x128xf32, #tpu.memory_space<vmem>>, vector<32x128xf32>
    %cst_5 = arith.constant dense<0.000000e+00> : vector<2x128xf32>
    %5 = tpu.matmul %3, %4, %cst_5 {dimension_numbers = #tpu.dot_dimension_numbers<[1], [0], [0], [1], [0, 0, 1, 1], [], []>} : vector<2x32xf32>, vector<32x128xf32>, vector<2x128xf32> -> vector<2x128xf32>
    %c0_6 = arith.constant 0 : index
    %c0_7 = arith.constant 0 : index
    %6 = vector.load %arg4[%c0_6, %c0_7] : memref<1x128xf32, #tpu.memory_space<vmem>>, vector<1x128xf32>
    %7 = vector.broadcast %6 : vector<1x128xf32> to vector<2x128xf32>
    %8 = arith.subf %7, %5 : vector<2x128xf32>
    %9 = vector.shape_cast %0 : vector<2x8x32xf32> to vector<16x32xf32>
    %c0_8 = arith.constant 0 : index
    %c0_9 = arith.constant 0 : index
    %10 = vector.load %arg2[%c0_8, %c0_9] : memref<32x128xf32, #tpu.memory_space<vmem>>, vector<32x128xf32>
    %cst_10 = arith.constant dense<0.000000e+00> : vector<16x128xf32>
    %11 = tpu.matmul %9, %10, %cst_10 {dimension_numbers = #tpu.dot_dimension_numbers<[1], [0], [0], [1], [0, 0, 1, 1], [], []>} : vector<16x32xf32>, vector<32x128xf32>, vector<16x128xf32> -> vector<16x128xf32>
    %12 = vector.shape_cast %11 : vector<16x128xf32> to vector<2x8x128xf32>
    %13 = vector.shape_cast %8 : vector<2x128xf32> to vector<2x1x128xf32>
    %14 = vector.broadcast %13 : vector<2x1x128xf32> to vector<2x8x128xf32>
    %15 = arith.addf %12, %14 : vector<2x8x128xf32>
    %c0_11 = arith.constant 0 : index
    %c0_12 = arith.constant 0 : index
    %c0_13 = arith.constant 0 : index
    %16 = vector.load %arg5[%c0_11, %c0_12, %c0_13] : memref<2x8x128xf32, #tpu.memory_space<vmem>>, vector<2x8x128xf32>
    tpu.vector_store %arg5[%c0_11, %c0_12, %c0_13], %15 {strides = array<i32>} : memref<2x8x128xf32, #tpu.memory_space<vmem>>, vector<2x8x128xf32>,
    return
  }
  func.func @transform_0(%arg0: i32) -> (i32, i32, i32) {
    %c0_i32 = arith.constant 0 : i32
    %c0_i32_0 = arith.constant 0 : i32
    %c0_i32_1 = arith.constant 0 : i32
    return %arg0, %c0_i32, %c0_i32_0 : i32, i32, i32
  }
  func.func @transform_1(%arg0: i32) -> (i32, i32) {
    %c0_i32 = arith.constant 0 : i32
    %c0_i32_0 = arith.constant 0 : i32
    %c0_i32_1 = arith.constant 0 : i32
    return %c0_i32, %c0_i32_0 : i32, i32
  }
  func.func @transform_2(%arg0: i32) -> (i32, i32) {
    %c0_i32 = arith.constant 0 : i32
    %c0_i32_0 = arith.constant 0 : i32
    %c0_i32_1 = arith.constant 0 : i32
    return %c0_i32, %c0_i32_0 : i32, i32
  }
  func.func @transform_3(%arg0: i32) -> (i32, i32) {
    %c0_i32 = arith.constant 0 : i32
    %c0_i32_0 = arith.constant 0 : i32
    %c0_i32_1 = arith.constant 0 : i32
    return %c0_i32, %c0_i32_0 : i32, i32
  }
  func.func @transform_4(%arg0: i32) -> (i32, i32, i32) {
    %c0_i32 = arith.constant 0 : i32
    %c0_i32_0 = arith.constant 0 : i32
    %c0_i32_1 = arith.constant 0 : i32
    return %arg0, %c0_i32, %c0_i32_0 : i32, i32, i32
  }
}

</mosaic_0001>

<bundles_post_ra>
// kernel: tpu_custom_call.1
= control target key start
LH: loop header
LB: loop body
LE: loop exit
PB: predicated region body
PF: predicated region fallthrough
CT: control target
= control target key end

     0   :  { %9 = vsyncpa [#allocation3], 0  ;;  %s361_s0 = inlined_call_operand.hbm [shape: f32[2,8,32], index: 0, kind: input, shape index: {}]   ;;  %s362_s1 = inlined_call_operand.hbm [shape: f32[32,128], index: 1, kind: input, shape index: {}]   ;;  %s363_s2 = inlined_call_operand.hbm [shape: f32[32,128], index: 2, kind: input, shape index: {}]   ;;  %s364_s3 = inlined_call_operand.vmem [shape: f32[1,128], index: 3, kind: input, shape index: {}]   ;;  %s365_s4 = inlined_call_operand.hbm [shape: f32[2,8,128], index: 4, kind: output, shape index: {}]  }
   0x1   :  { %10 = vsyncpa [#allocation6], 0 }
   0x2   :  { %11 = vsyncpa [#allocation4], 0  ;;  %s29_s17 = sshll.u32 %s362_s1, 4  ;;  %s298_s18 = smov [#allocation5]   ;;  %s30_s17 = int_to_ptr.hbm [resolvable:$true] %s29_s17 }
   0x3   :  { %s31_s19 = sshll.u32 %s298_s18, 4  ;;  %s16_s22 = sshll.u32 %s361_s0, 4  ;;  %s32_s19 = int_to_ptr.vmem [resolvable:$true] %s31_s19  ;;  %s17_s22 = int_to_ptr.hbm [resolvable:$true] %s16_s22 }
   0x4   :  { %s299_s23 = smov 128   ;;  %s300_s24 = smov 8  }
   0x5   :  { %37 = dma.hbm_to_vmem [thread:$0]  %s30_s17, 512, %s32_s19, [#allocation6], %s299_s23, %s299_s23, %s300_s24  }
   0x6   :  { %s301_s25 = smov [#allocation2]   ;;  %s42_s1 = sshll.u32 %s363_s2, 4  ;;  %s43_s1 = int_to_ptr.hbm [resolvable:$true] %s42_s1 }
   0x7   :  { %s18_s26 = sshll.u32 %s301_s25, 4  ;;  %s302_s0 = smov [#allocation7]   ;;  %s19_s26 = int_to_ptr.vmem [resolvable:$true] %s18_s26 }
   0x8   :  { %24 = dma.hbm_to_vmem [thread:$0]  %s17_s22, 256, %s19_s26, [#allocation3], %s299_s23, %s299_s23, %s300_s24  }
   0x9   :  { %s44_s29 = sshll.u32 %s302_s0, 4  ;;  %s45_s29 = int_to_ptr.vmem [resolvable:$true] %s44_s29 }
   0xa   :  { %50 = dma.hbm_to_vmem [thread:$0]  %s43_s1, 512, %s45_s29, [#allocation6], %s299_s23, %s299_s23, %s300_s24  }
   0xb   :  { %292 = dma.done.wait [#allocation3], 256  }
   0xc   :  { %293 = vsyncadd [#allocation3], 4294967040 }
   0xd   :  { %294 = dma.done.wait [#allocation6], 1024  }
   0xe   :  { %295 = vsyncadd [#allocation6], 4294966272  ;;  %v87_v0 = vld [vmem:[#allocation7 + $0x18] sm:$0xff]  ;;  %v86_v2 = vld [vmem:[#allocation7 + $0x10] sm:$0xff]  ;;  %vm67_vm0 = vcmask 261120   ;;  %vm90_vm1 = vcmask 1041409  }
   0xf   :  { %v122_v1 = vld [vmem:[#allocation5 + $0x18] sm:$0xff]  ;;  %106 = vmatpush.msra.mxu0 %v87_v0  ;;  %v121_v3 = vld [vmem:[#allocation5 + $0x10] sm:$0xff]  ;;  %v85_v4 = vld [vmem:[#allocation7 + $0x8] sm:$0xff]  ;;  %s303_s5 = smov [#allocation8]   ;;  %s168_s9 = sshll.u32 %s365_s4, 4  ;;  %s169_s9 = int_to_ptr.hbm [resolvable:$true] %s168_s9 }
  0x10   :  { %185 = vmatpush.msra.mxu2 %v122_v1  ;;  %141 = vmatpush.msra.mxu1 %v122_v1  ;;  %v120_v5 = vld [vmem:[#allocation5 + $0x8] sm:$0xff]  ;;  %v65_v6 = vld [vmem:[#allocation2] sm:$0xff]  ;;  %v66_v7 = vld [vmem:[#allocation2 + $0x8] sm:$0xff]  ;;  %s166_s6 = sshll.u32 %s303_s5, 4  ;;  %s167_s6 = int_to_ptr.vmem [resolvable:$true] %s166_s6 }
  0x11   :  { %107 = vmatpush.msra.mxu0 %v86_v2  ;;  %v68_v8 = vsel %vm67_vm0, %v65_v6, 0.0  ;;  %v84_v9 = vld [vmem:[#allocation7] sm:$0xff]  ;;  %v75_v12 = vsel %vm67_vm0, %v66_v7, 0.0  ;;  %v195_v27 = vld [vmem:[%s364_s3] ss:$0 sm:$0xff] }
  0x12   :  { %186 = vmatpush.msra.mxu2 %v121_v3  ;;  %142 = vmatpush.msra.mxu1 %v121_v3  ;;  %v119_v10 = vld [vmem:[#allocation5] sm:$0xff]  ;;  %v69_v11 = vrot.slane %v68_v8, 4  ;;  %v76_v13 = vrot.slane %v75_v12, 4 }
  0x13   :  { %108 = vmatpush.msra.mxu0 %v85_v4 }
  0x14   :  { %187 = vmatpush.msra.mxu2 %v120_v5  ;;  %v70_v14 = vadd.f32 %v69_v11, %v68_v8  ;;  %143 = vmatpush.msra.mxu1 %v120_v5  ;;  %v77_v15 = vadd.f32 %v76_v13, %v75_v12 }
  0x15   :  { %109 = vmatpush.msra.mxu0 %v84_v9 }
  0x16   :  { %188 = vmatpush.msra.mxu2 %v119_v10  ;;  %v71_v16 = vrot.slane %v70_v14, 2  ;;  %144 = vmatpush.msra.mxu1 %v119_v10  ;;  %v78_v17 = vrot.slane %v77_v15, 2 }
  0x17   :  { %184 = vmatmul.msk.f32.vlgmr.msra.gmra.mxu2 %vm67_vm0, %v66_v7  ;;  %183 = vmatmul.msk.f32.vlgmr.msra.gmra.mxu1 %vm67_vm0, %v65_v6 }
  0x18   :  { %v72_v18 = vadd.f32 %v71_v16, %v70_v14  ;;  %v79_v19 = vadd.f32 %v78_v17, %v77_v15 }
  0x1a   :  { %v73_v20 = vrot.slane %v72_v18, 1  ;;  %v80_v21 = vrot.slane %v79_v19, 1 }
  0x1c   :  { %v74_v22 = vadd.f32 %v73_v20, %v72_v18  ;;  %v81_v23 = vadd.f32 %v80_v21, %v79_v19 }
  0x1e   :  { %v82_v24 = vmul.f32 0.125, %v74_v22  ;;  %v83_v25 = vmul.f32 0.125, %v81_v23 }
  0x20   :  { %v91_v26 = vsel %vm90_vm1, %v83_v25, %v82_v24 }
  0x21   :  { %182 = vmatmul.msk.f32.vlgmr.msra.gmra.mxu0 %vm67_vm0, %v91_v26 }
  0x94   :  { %v146_v30 = vpop.f32.mrf.mxu1 }
  0x9a   :  { %v149_v33 = vpop.f32.mrf.mxu2 }
  0x9e   :  { %v111_v28 = vpop.f32.mrf.mxu0 }
  0x9f   :  { %v118_v29 = vsub.f32 %v195_v27, %v111_v28 }
  0xa1   :  { %v153_v31 = vrot.slane %v118_v29, 1  ;;  %v154_v32 = vperm.slane %v118_v29, 0 }
  0xa3   :  { %v158_v34 = vadd.f32 %v154_v32, %v146_v30  ;;  %v155_v35 = vperm.slane %v153_v31, 0 }
  0xa5   :  { %160 = vst [vmem:[#allocation8] sm:$0xff] %v158_v34  ;;  %v159_v36 = vadd.f32 %v155_v35, %v149_v33 }
  0xa7   :  { %161 = vst [vmem:[#allocation8 + $0x8] sm:$0xff] %v159_v36 }
  0xa8   :  { %174 = dma.vmem_to_hbm [thread:$0]  %s167_s6, 256, %s169_s9, [#allocation4], %s299_s23, %s299_s23, %s300_s24  }
  0xa9   :  { %296 = dma.done.wait [#allocation4], 256  }
  0xaa   :  { %297 = vsyncadd [#allocation4], 4294967040 }
  0xab   :  { %179 = vsyncpa [#allocation3], 1 }
  0xac   :  { %180 = vsyncpa [#allocation6], 1 }
  0xad   :  { %181 = vsyncpa [#allocation4], 1 }

// kernel: tpu_custom_call.1
= control target key start
LH: loop header
LB: loop body
LE: loop exit
PB: predicated region body
PF: predicated region fallthrough
CT: control target
= control target key end

     0   :  { %9 = vsyncpa [#allocation3], 0  ;;  %s361_s0 = inlined_call_operand.hbm [shape: f32[2,8,32], index: 0, kind: input, shape index: {}]   ;;  %s362_s1 = inlined_call_operand.hbm [shape: f32[32,128], index: 1, kind: input, shape index: {}]   ;;  %s363_s2 = inlined_call_operand.hbm [shape: f32[32,128], index: 2, kind: input, shape index: {}]   ;;  %s364_s3 = inlined_call_operand.vmem [shape: f32[1,128], index: 3, kind: input, shape index: {}]   ;;  %s365_s4 = inlined_call_operand.hbm [shape: f32[2,8,128], index: 4, kind: output, shape index: {}]  }
   0x1   :  { %10 = vsyncpa [#allocation6], 0 }
   0x2   :  { %11 = vsyncpa [#allocation4], 0  ;;  %s29_s17 = sshll.u32 %s362_s1, 4  ;;  %s298_s18 = smov [#allocation5]   ;;  %s30_s17 = int_to_ptr.hbm [resolvable:$true] %s29_s17 }
   0x3   :  { %s31_s19 = sshll.u32 %s298_s18, 4  ;;  %s16_s22 = sshll.u32 %s361_s0, 4  ;;  %s32_s19 = int_to_ptr.vmem [resolvable:$true] %s31_s19  ;;  %s17_s22 = int_to_ptr.hbm [resolvable:$true] %s16_s22 }
   0x4   :  { %s299_s23 = smov 128   ;;  %s300_s24 = smov 8  }
   0x5   :  { %37 = dma.hbm_to_vmem [thread:$0]  %s30_s17, 512, %s32_s19, [#allocation6], %s299_s23, %s299_s23, %s300_s24  }
   0x6   :  { %s301_s25 = smov [#allocation2]   ;;  %s42_s1 = sshll.u32 %s363_s2, 4  ;;  %s43_s1 = int_to_ptr.hbm [resolvable:$true] %s42_s1 }
   0x7   :  { %s18_s26 = sshll.u32 %s301_s25, 4  ;;  %s302_s0 = smov [#allocation7]   ;;  %s19_s26 = int_to_ptr.vmem [resolvable:$true] %s18_s26 }
   0x8   :  { %24 = dma.hbm_to_vmem [thread:$0]  %s17_s22, 256, %s19_s26, [#allocation3], %s299_s23, %s299_s23, %s300_s24  }
   0x9   :  { %s44_s29 = sshll.u32 %s302_s0, 4  ;;  %s45_s29 = int_to_ptr.vmem [resolvable:$true] %s44_s29 }
   0xa   :  { %50 = dma.hbm_to_vmem [thread:$0]  %s43_s1, 512, %s45_s29, [#allocation6], %s299_s23, %s299_s23, %s300_s24  }
   0xb   :  { %292 = dma.done.wait [#allocation3], 256  }
   0xc   :  { %293 = vsyncadd [#allocation3], 4294967040 }
   0xd   :  { %294 = dma.done.wait [#allocation6], 1024  }
   0xe   :  { %295 = vsyncadd [#allocation6], 4294966272  ;;  %v87_v0 = vld [vmem:[#allocation7 + $0x18] sm:$0xff]  ;;  %v86_v2 = vld [vmem:[#allocation7 + $0x10] sm:$0xff]  ;;  %vm67_vm0 = vcmask 261120   ;;  %vm90_vm1 = vcmask 1041409  }
   0xf   :  { %v122_v1 = vld [vmem:[#allocation5 + $0x18] sm:$0xff]  ;;  %106 = vmatpush.msra.mxu0 %v87_v0  ;;  %v121_v3 = vld [vmem:[#allocation5 + $0x10] sm:$0xff]  ;;  %v85_v4 = vld [vmem:[#allocation7 + $0x8] sm:$0xff]  ;;  %s303_s5 = smov [#allocation8]   ;;  %s168_s9 = sshll.u32 %s365_s4, 4  ;;  %s169_s9 = int_to_ptr.hbm [resolvable:$true] %s168_s9 }
  0x10   :  { %185 = vmatpush.msra.mxu2 %v122_v1  ;;  %141 = vmatpush.msra.mxu1 %v122_v1  ;;  %v120_v5 = vld [vmem:[#allocation5 + $0x8] sm:$0xff]  ;;  %v65_v6 = vld [vmem:[#allocation2] sm:$0xff]  ;;  %v66_v7 = vld [vmem:[#allocation2 + $0x8] sm:$0xff]  ;;  %s166_s6 = sshll.u32 %s303_s5, 4  ;;  %s167_s6 = int_to_ptr.vmem [resolvable:$true] %s166_s6 }
  0x11   :  { %107 = vmatpush.msra.mxu0 %v86_v2  ;;  %v68_v8 = vsel %vm67_vm0, %v65_v6, 0.0  ;;  %v84_v9 = vld [vmem:[#allocation7] sm:$0xff]  ;;  %v75_v12 = vsel %vm67_vm0, %v66_v7, 0.0  ;;  %v195_v27 = vld [vmem:[%s364_s3] ss:$0 sm:$0xff] }
  0x12   :  { %186 = vmatpush.msra.mxu2 %v121_v3  ;;  %142 = vmatpush.msra.mxu1 %v121_v3  ;;  %v119_v10 = vld [vmem:[#allocation5] sm:$0xff]  ;;  %v69_v11 = vrot.slane %v68_v8, 4  ;;  %v76_v13 = vrot.slane %v75_v12, 4 }
  0x13   :  { %108 = vmatpush.msra.mxu0 %v85_v4 }
  0x14   :  { %187 = vmatpush.msra.mxu2 %v120_v5  ;;  %v70_v14 = vadd.f32 %v69_v11, %v68_v8  ;;  %143 = vmatpush.msra.mxu1 %v120_v5  ;;  %v77_v15 = vadd.f32 %v76_v13, %v75_v12 }
  0x15   :  { %109 = vmatpush.msra.mxu0 %v84_v9 }
  0x16   :  { %188 = vmatpush.msra.mxu2 %v119_v10  ;;  %v71_v16 = vrot.slane %v70_v14, 2  ;;  %144 = vmatpush.msra.mxu1 %v119_v10  ;;  %v78_v17 = vrot.slane %v77_v15, 2 }
  0x17   :  { %184 = vmatmul.msk.f32.vlgmr.msra.gmra.mxu2 %vm67_vm0, %v66_v7  ;;  %183 = vmatmul.msk.f32.vlgmr.msra.gmra.mxu1 %vm67_vm0, %v65_v6 }
  0x18   :  { %v72_v18 = vadd.f32 %v71_v16, %v70_v14  ;;  %v79_v19 = vadd.f32 %v78_v17, %v77_v15 }
  0x1a   :  { %v73_v20 = vrot.slane %v72_v18, 1  ;;  %v80_v21 = vrot.slane %v79_v19, 1 }
  0x1c   :  { %v74_v22 = vadd.f32 %v73_v20, %v72_v18  ;;  %v81_v23 = vadd.f32 %v80_v21, %v79_v19 }
  0x1e   :  { %v82_v24 = vmul.f32 0.125, %v74_v22  ;;  %v83_v25 = vmul.f32 0.125, %v81_v23 }
  0x20   :  { %v91_v26 = vsel %vm90_vm1, %v83_v25, %v82_v24 }
  0x21   :  { %182 = vmatmul.msk.f32.vlgmr.msra.gmra.mxu0 %vm67_vm0, %v91_v26 }
  0x94   :  { %v146_v30 = vpop.f32.mrf.mxu1 }
  0x9a   :  { %v149_v33 = vpop.f32.mrf.mxu2 }
  0x9e   :  { %v111_v28 = vpop.f32.mrf.mxu0 }
  0x9f   :  { %v118_v29 = vsub.f32 %v195_v27, %v111_v28 }
  0xa1   :  { %v153_v31 = vrot.slane %v118_v29, 1  ;;  %v154_v32 = vperm.slane %v118_v29, 0 }
  0xa3   :  { %v158_v34 = vadd.f32 %v154_v32, %v146_v30  ;;  %v155_v35 = vperm.slane %v153_v31, 0 }
  0xa5   :  { %160 = vst [vmem:[#allocation8] sm:$0xff] %v158_v34  ;;  %v159_v36 = vadd.f32 %v155_v35, %v149_v33 }
  0xa7   :  { %161 = vst [vmem:[#allocation8 + $0x8] sm:$0xff] %v159_v36 }
  0xa8   :  { %174 = dma.vmem_to_hbm [thread:$0]  %s167_s6, 256, %s169_s9, [#allocation4], %s299_s23, %s299_s23, %s300_s24  }
  0xa9   :  { %296 = dma.done.wait [#allocation4], 256  }
  0xaa   :  { %297 = vsyncadd [#allocation4], 4294967040 }
  0xab   :  { %179 = vsyncpa [#allocation3], 1 }
  0xac   :  { %180 = vsyncpa [#allocation6], 1 }
  0xad   :  { %181 = vsyncpa [#allocation4], 1 }

</bundles_post_ra>
